<compile_context>
chip_gen: v5e
topology: v5e:2x2
jax: 0.10.0
libtpu: 0.0.40
codegen_flags: <defaults>
</compile_context>

<pallas_src>
import functools

import jax
import jax.numpy as jnp
import numpy as np
from jax import lax
from jax.experimental import pallas as pl
from jax.experimental.pallas import tpu as pltpu


# ---------------------------------------------------------------------------
# Pallas kernels
# ---------------------------------------------------------------------------
def _conv_phase_stats_kernel(x_ref, w_ref, y_ref, s1_ref, s2_ref, acc1, acc2):
    """Phase-decomposed ConvTranspose3d block + fused per-row stats.

    x_ref : (1, 27*Cin, cols)  27 unit-shifted views of the pad-1 input, stacked on
                               the channel axis; cols = slab of flattened (d,h,w).
    w_ref : (Cout*8, 27*Cin)   flattened per-shift weight bank; row = co*8 + phase.
    y_ref : (1, Cout*8, cols)  all 8 output phases for this slab (lane-dense store).
    s1/s2 : (1, Cout*8, 1)     per-(co,phase) sum / sum-of-squares over all columns.
    acc1/acc2: VMEM scratch accumulators for the stats (live across the column axis).
    """
    j = pl.program_id(1)
    acc = jnp.dot(w_ref[...], x_ref[0], preferred_element_type=jnp.float32)  # (C8,cols)
    y_ref[0] = acc

    ps = jnp.sum(acc, axis=-1, keepdims=True)          # (C8, 1)  (XLU, free slot)
    pq = jnp.sum(acc * acc, axis=-1, keepdims=True)    # (C8, 1)

    @pl.when(j == 0)
    def _():
        acc1[...] = jnp.zeros_like(acc1)
        acc2[...] = jnp.zeros_like(acc2)

    acc1[...] += ps
    acc2[...] += pq

    @pl.when(j == pl.num_programs(1) - 1)
    def _():
        s1_ref[0] = acc1[...]
        s2_ref[0] = acc2[...]


def _inorm_relu_kernel(s1_ref, s2_ref, g_ref, b_ref, y_ref, o_ref, *, eps, inv_n):
    """Fused InstanceNorm3d(affine=True) + ReLU using precomputed partial stats.

    s1/s2: (tr, 8)  per-(instance-row, phase) sum / sum-of-squares
    g/b  : (tr, 1)  affine gamma / beta per instance row
    y/o  : (tr, tl) column slab of the phase-major conv output
    """
    mean = jnp.sum(s1_ref[...], axis=-1, keepdims=True) * inv_n     # (tr, 1)
    ex2 = jnp.sum(s2_ref[...], axis=-1, keepdims=True) * inv_n
    var = ex2 - mean * mean                                          # biased (torch)
    inv = lax.rsqrt(var + eps)
    scale = g_ref[...] * inv
    shift = b_ref[...] - mean * scale
    o_ref[...] = jnp.maximum(y_ref[...] * scale + shift, 0.0)


# ---------------------------------------------------------------------------
# Glue helpers (tiny, plain JAX)
# ---------------------------------------------------------------------------
def _phase_shift_weights(wt):
    """ConvTranspose3d weight (Cin, Cout, 4, 4, 4) -> (27, Cout*8, Cin) bank.

    For shift s = (sd, sh, sw) of the pad-1 input, row co*8 + p
    (p = pd*4 + ph*2 + pw) holds the kernel tap contributed by that shift to output
    phase (pd, ph, pw); rows of phases that do not use this shift stay zero.
    Per dim:  od = 2*q + p,  od = 2*id + k - 1  ->  with xpad[j] = x[j-1] the
    contribution of xpad[q + s] to phase p exists iff s - p in {0, 1}, with
    k = 3 + p - 2*s.
    """
    Cin, Cout = wt.shape[0], wt.shape[1]
    banks = []
    for sd in range(3):
        for sh in range(3):
            for sw in range(3):
                blk = jnp.zeros((Cout * 8, Cin), wt.dtype)
                for pd in range(2):
                    if sd - pd not in (0, 1):
                        continue
                    for ph in range(2):
                        if sh - ph not in (0, 1):
                            continue
                        for pw in range(2):
                            if sw - pw not in (0, 1):
                                continue
                            kd = 3 + pd - 2 * sd
                            kh = 3 + ph - 2 * sh
                            kw = 3 + pw - 2 * sw
                            p = pd * 4 + ph * 2 + pw
                            blk = blk.at[p::8, :].set(wt[:, :, kd, kh, kw].T)
                banks.append(blk)
    return jnp.stack(banks, axis=0)                      # (27, Cout*8, Cin)


def _shift_bank(x):
    """x: (N, Cin, D, H, W) -> (N, 27*Cin, D*H*W) unit-shifted views of pad-1 input,
    shift-major / Cin-minor along the channel axis (matches the weight flattening)."""
    N, Cin, D, H, W = x.shape
    xpad = jnp.pad(x, ((0, 0), (0, 0), (1, 1), (1, 1), (1, 1)))
    views = [xpad[:, :, sd:sd + D, sh:sh + H, sw:sw + W]
             for sd in range(3) for sh in range(3) for sw in range(3)]
    xs = jnp.stack(views, axis=1)                        # (N, 27, Cin, D, H, W)
    return xs.reshape(N, 27 * Cin, D * H * W)


def _pick_col_block(total, max_cols):
    """Largest multiple-of-128 divisor of `total` not exceeding max_cols
    (falls back to the full extent, which is always a legal block size)."""
    if total % 128 != 0:
        return total
    best = 128
    b = 128
    while b <= min(total, max_cols):
        if total % b == 0:
            best = b
        b += 128
    return best


# ---------------------------------------------------------------------------
# Forward pass
# ---------------------------------------------------------------------------
def upsample3d_forward(x, wt, gamma, beta, *, eps=1e-5,
                       compute_dtype=jnp.float32,
                       conv_max_cols=2048, norm_max_cols=8192):
    """x: (N, Cin, D, H, W); wt: (Cin, Cout, 4, 4, 4) (torch ConvTranspose3d layout).

    Returns (N, Cout, 2D, 2H, 2W) float32.
    Use compute_dtype=jnp.bfloat16 on v6e/v7x to halve conv-input HBM traffic
    (f32 accumulation is kept); the f32 default preserves the 1e-4 reference check.
    """
    N, Cin, D, H, W = x.shape
    Cout = wt.shape[1]
    Do, Ho, Wo = 2 * D, 2 * H, 2 * W
    DHW = D * H * W
    P = 8                                   # 2x2x2 sub-pixel phases of the stride-2 deconv
    C8 = Cout * P
    K = 27 * Cin

    # --- glue: shifted-view bank (27x input, vs 512x of a dilated im2col) + weights --
    # TODO(synk): for very large volumes, replace the XLA-built 27x bank with in-kernel
    #   halo loads (manual DMA) to cut HBM traffic on the conv input to ~1x.
    xs = _shift_bank(x).astype(compute_dtype)                        # (N, K, DHW)
    w27 = _phase_shift_weights(wt).astype(compute_dtype)             # (27, C8, Cin)
    w_flat = jnp.transpose(w27, (1, 0, 2)).reshape(C8, K)            # (C8, K)

    # --- Pallas kernel 1: phase-decomposed transposed conv + fused stats -------------
    cols = _pick_col_block(DHW, conv_max_cols)
    y_phase, s1, s2 = pl.pallas_call(
        _conv_phase_stats_kernel,
        out_shape=(jax.ShapeDtypeStruct((N, C8, DHW), jnp.float32),
                   jax.ShapeDtypeStruct((N, C8, 1), jnp.float32),
                   jax.ShapeDtypeStruct((N, C8, 1), jnp.float32)),
        grid_spec=pltpu.PrefetchScalarGridSpec(
            num_scalar_prefetch=0,
            grid=(N, DHW // cols),
            in_specs=[
                pl.BlockSpec((1, K, cols), lambda n, j: (n, 0, j)),
                pl.BlockSpec((C8, K), lambda n, j: (0, 0)),
            ],
            out_specs=(
                pl.BlockSpec((1, C8, cols), lambda n, j: (n, 0, j)),
                pl.BlockSpec((1, C8, 1), lambda n, j: (n, 0, 0)),
                pl.BlockSpec((1, C8, 1), lambda n, j: (n, 0, 0)),
            ),
            scratch_shapes=[pltpu.VMEM((C8, 1), jnp.float32),
                            pltpu.VMEM((C8, 1), jnp.float32)],
        ),
        compiler_params=pltpu.CompilerParams(
            dimension_semantics=("parallel", "arbitrary")),
    )(xs, w_flat)

    # free reshapes (row-major): rows = (n, co) instances, cols = (phase, d, h, w).
    R = N * Cout
    L = P * DHW                                          # == Do * Ho * Wo
    y_rows = y_phase.reshape(R, L)
    sum_rows = s1.reshape(R, P)
    sq_rows = s2.reshape(R, P)
    g_rows = jnp.tile(gamma.astype(jnp.float32), (N,)).reshape(R, 1)
    b_rows = jnp.tile(beta.astype(jnp.float32), (N,)).reshape(R, 1)

    # --- Pallas kernel 2: fused InstanceNorm3d + ReLU (fully column-tiled) -----------
    tr = 8 if R % 8 == 0 else R
    tl = _pick_col_block(L, norm_max_cols)
    out_rows = pl.pallas_call(
        functools.partial(_inorm_relu_kernel, eps=eps, inv_n=1.0 / L),
        out_shape=jax.ShapeDtypeStruct((R, L), jnp.float32),
        grid_spec=pltpu.PrefetchScalarGridSpec(
            num_scalar_prefetch=0,
            grid=(R // tr, L // tl),
            in_specs=[pl.BlockSpec((tr, P), lambda i, j: (i, 0)),
                      pl.BlockSpec((tr, P), lambda i, j: (i, 0)),
                      pl.BlockSpec((tr, 1), lambda i, j: (i, 0)),
                      pl.BlockSpec((tr, 1), lambda i, j: (i, 0)),
                      pl.BlockSpec((tr, tl), lambda i, j: (i, j))],
            out_specs=pl.BlockSpec((tr, tl), lambda i, j: (i, j)),
        ),
        compiler_params=pltpu.CompilerParams(
            dimension_semantics=("parallel", "parallel")),
    )(sum_rows, sq_rows, g_rows, b_rows, y_rows)

    # --- glue: de-interleave the 8 phases into NCDHW (single cheap XLA transpose) ----
    out = out_rows.reshape(N, Cout, 2, 2, 2, D, H, W)      # (n, c, pd, ph, pw, d, h, w)
    out = jnp.transpose(out, (0, 1, 5, 2, 6, 3, 7, 4))      # (n, c, d, pd, h, ph, w, pw)
    return out.reshape(N, Cout, Do, Ho, Wo)


# ---------------------------------------------------------------------------
# Pure-JAX reference (for validation only)
# ---------------------------------------------------------------------------
def _reference(x, wt, gamma, beta, eps=1e-5):
    wc = jnp.transpose(wt[:, :, ::-1, ::-1, ::-1], (1, 0, 2, 3, 4))  # (Cout, Cin, 4,4,4)
    y = lax.conv_general_dilated(
        x, wc, window_strides=(1, 1, 1),
        padding=[(2, 2), (2, 2), (2, 2)],
        lhs_dilation=(2, 2, 2),
        dimension_numbers=('NCDHW', 'OIDHW', 'NCDHW'))
    mean = jnp.mean(y, axis=(2, 3, 4), keepdims=True)
    var = jnp.mean((y - mean) ** 2, axis=(2, 3, 4), keepdims=True)
    yn = (y - mean) / jnp.sqrt(var + eps)
    yn = yn * gamma[None, :, None, None, None] + beta[None, :, None, None, None]
    return jnp.maximum(yn, 0.0)


if __name__ == "__main__":
    key = jax.random.PRNGKey(0)
    k_x, k_w, k_g, k_b = jax.random.split(key, 4)

    N, Cin, Cout = 2, 4, 4
    D = H = W = 8                                     # output spatial = 16

    x = jax.random.normal(k_x, (N, Cin, D, H, W), dtype=jnp.float32)
    # ConvTranspose3d weight: (in_plane, out_plane, 4, 4, 4); bias=False (norm='instance')
    wt = 0.1 * jax.random.normal(k_w, (Cin, Cout, 4, 4, 4), dtype=jnp.float32)
    # InstanceNorm3d affine params (deterministic, non-trivial)
    gamma = 0.5 + jax.random.uniform(k_g, (Cout,), dtype=jnp.float32)
    beta = 0.1 * jax.random.normal(k_b, (Cout,), dtype=jnp.float32)

    out = upsample3d_forward(x, wt, gamma, beta)
    out = jax.block_until_ready(out)

    ref = jax.block_until_ready(_reference(x, wt, gamma, beta))
    assert out.shape == (N, Cout, 2 * D, 2 * H, 2 * W)
    assert out.dtype == jnp.float32
    np.testing.assert_allclose(np.asarray(out), np.asarray(ref),
                               atol=1e-4, rtol=1e-4)

    print("KERNEL_OK")
</pallas_src>

<mosaic_0001>
module attributes {stable_mosaic.version = 11 : i64} {
  func.func @_conv_phase_stats_kernel(%arg0: i32, %arg1: i32, %arg2: memref<1x108x512xf32, #tpu.memory_space<vmem>>, %arg3: memref<32x108xf32, #tpu.memory_space<vmem>>, %arg4: memref<1x32x512xf32, #tpu.memory_space<vmem>>, %arg5: memref<1x32x1xf32, #tpu.memory_space<vmem>>, %arg6: memref<1x32x1xf32, #tpu.memory_space<vmem>>, %arg7: memref<32x1xf32, #tpu.memory_space<vmem>>, %arg8: memref<32x1xf32, #tpu.memory_space<vmem>>) attributes {dimension_semantics = [#tpu.dimension_semantics<parallel>, #tpu.dimension_semantics<arbitrary>], iteration_bounds = array<i64: 2, 1>, scalar_prefetch = 0 : i64, scratch_operands = 2 : i64, tpu.core_type = #tpu.core_type<tc>, window_params = [{transform_indices = @transform_0, window_bounds = array<i64: 1, 108, 512>}, {pipeline_mode = #tpu.pipeline_mode<synchronous>, transform_indices = @transform_1, window_bounds = array<i64: 32, 108>}, {transform_indices = @transform_2, window_bounds = array<i64: 1, 32, 512>}, {transform_indices = @transform_3, window_bounds = array<i64: 1, 32, 1>}, {transform_indices = @transform_4, window_bounds = array<i64: 1, 32, 1>}]} {
    %c0 = arith.constant 0 : index
    %c0_0 = arith.constant 0 : index
    %0 = vector.load %arg3[%c0, %c0_0] : memref<32x108xf32, #tpu.memory_space<vmem>>, vector<32x108xf32>
    %c0_1 = arith.constant 0 : index
    %c0_2 = arith.constant 0 : index
    %c0_3 = arith.constant 0 : index
    %1 = vector.load %arg2[%c0_1, %c0_2, %c0_3] : memref<1x108x512xf32, #tpu.memory_space<vmem>>, vector<1x108x512xf32>
    %2 = vector.shape_cast %1 : vector<1x108x512xf32> to vector<108x512xf32>
    %cst = arith.constant dense<0.000000e+00> : vector<32x512xf32>
    %3 = tpu.matmul %0, %2, %cst {dimension_numbers = #tpu.dot_dimension_numbers<[1], [0], [0], [1], [0, 0, 1, 1], [], []>} : vector<32x108xf32>, vector<108x512xf32>, vector<32x512xf32> -> vector<32x512xf32>
    %c0_4 = arith.constant 0 : index
    %c0_5 = arith.constant 0 : index
    %c0_6 = arith.constant 0 : index
    %4 = vector.load %arg4[%c0_4, %c0_5, %c0_6] : memref<1x32x512xf32, #tpu.memory_space<vmem>>, vector<1x32x512xf32>
    %5 = vector.shape_cast %4 : vector<1x32x512xf32> to vector<32x512xf32>
    %6 = vector.shape_cast %3 : vector<32x512xf32> to vector<1x32x512xf32>
    tpu.vector_store %arg4[%c0_4, %c0_5, %c0_6], %6 {strides = array<i32>} : memref<1x32x512xf32, #tpu.memory_space<vmem>>, vector<1x32x512xf32>,
    %cst_7 = arith.constant dense<0.000000e+00> : vector<32xf32>
    %7 = vector.multi_reduction <add>, %3, %cst_7 [1] : vector<32x512xf32> to vector<32xf32>
    %8 = vector.shape_cast %7 : vector<32xf32> to vector<32x1xf32>
    %9 = arith.mulf %3, %3 : vector<32x512xf32>
    %cst_8 = arith.constant dense<0.000000e+00> : vector<32xf32>
    %10 = vector.multi_reduction <add>, %9, %cst_8 [1] : vector<32x512xf32> to vector<32xf32>
    %11 = vector.shape_cast %10 : vector<32xf32> to vector<32x1xf32>
    %c0_i32 = arith.constant 0 : i32
    %12 = arith.cmpi eq, %arg1, %c0_i32 : i32
    %13 = arith.extui %12 : i1 to i32
    %c0_i32_9 = arith.constant 0 : i32
    %14 = arith.cmpi ne, %13, %c0_i32_9 : i32
    scf.if %14 {
      %cst_20 = arith.constant 0.000000e+00 : f32
      %24 = vector.broadcast %cst_20 : f32 to vector<32x1xf32>
      %c0_21 = arith.constant 0 : index
      %c0_22 = arith.constant 0 : index
      %25 = vector.load %arg7[%c0_21, %c0_22] : memref<32x1xf32, #tpu.memory_space<vmem>>, vector<32x1xf32>
      tpu.vector_store %arg7[%c0_21, %c0_22], %24 {strides = array<i32>} : memref<32x1xf32, #tpu.memory_space<vmem>>, vector<32x1xf32>,
      %cst_23 = arith.constant 0.000000e+00 : f32
      %26 = vector.broadcast %cst_23 : f32 to vector<32x1xf32>
      %c0_24 = arith.constant 0 : index
      %c0_25 = arith.constant 0 : index
      %27 = vector.load %arg8[%c0_24, %c0_25] : memref<32x1xf32, #tpu.memory_space<vmem>>, vector<32x1xf32>
      tpu.vector_store %arg8[%c0_24, %c0_25], %26 {strides = array<i32>} : memref<32x1xf32, #tpu.memory_space<vmem>>, vector<32x1xf32>,
    } else {
    }
    %c0_10 = arith.constant 0 : index
    %c0_11 = arith.constant 0 : index
    %15 = vector.load %arg7[%c0_10, %c0_11] : memref<32x1xf32, #tpu.memory_space<vmem>>, vector<32x1xf32>
    %16 = arith.addf %15, %8 : vector<32x1xf32>
    %c0_12 = arith.constant 0 : index
    %c0_13 = arith.constant 0 : index
    %17 = vector.load %arg7[%c0_12, %c0_13] : memref<32x1xf32, #tpu.memory_space<vmem>>, vector<32x1xf32>
    tpu.vector_store %arg7[%c0_12, %c0_13], %16 {strides = array<i32>} : memref<32x1xf32, #tpu.memory_space<vmem>>, vector<32x1xf32>,
    %c0_14 = arith.constant 0 : index
    %c0_15 = arith.constant 0 : index
    %18 = vector.load %arg8[%c0_14, %c0_15] : memref<32x1xf32, #tpu.memory_space<vmem>>, vector<32x1xf32>
    %19 = arith.addf %18, %11 : vector<32x1xf32>
    %c0_16 = arith.constant 0 : index
    %c0_17 = arith.constant 0 : index
    %20 = vector.load %arg8[%c0_16, %c0_17] : memref<32x1xf32, #tpu.memory_space<vmem>>, vector<32x1xf32>
    tpu.vector_store %arg8[%c0_16, %c0_17], %19 {strides = array<i32>} : memref<32x1xf32, #tpu.memory_space<vmem>>, vector<32x1xf32>,
    %c0_i32_18 = arith.constant 0 : i32
    %21 = arith.cmpi eq, %arg1, %c0_i32_18 : i32
    %22 = arith.extui %21 : i1 to i32
    %c0_i32_19 = arith.constant 0 : i32
    %23 = arith.cmpi ne, %22, %c0_i32_19 : i32
    scf.if %23 {
      %c0_20 = arith.constant 0 : index
      %c0_21 = arith.constant 0 : index
      %24 = vector.load %arg7[%c0_20, %c0_21] : memref<32x1xf32, #tpu.memory_space<vmem>>, vector<32x1xf32>
      %c0_22 = arith.constant 0 : index
      %c0_23 = arith.constant 0 : index
      %c0_24 = arith.constant 0 : index
      %25 = vector.load %arg5[%c0_22, %c0_23, %c0_24] : memref<1x32x1xf32, #tpu.memory_space<vmem>>, vector<1x32x1xf32>
      %26 = vector.shape_cast %25 : vector<1x32x1xf32> to vector<32x1xf32>
      %27 = vector.shape_cast %24 : vector<32x1xf32> to vector<1x32x1xf32>
      tpu.vector_store %arg5[%c0_22, %c0_23, %c0_24], %27 {strides = array<i32>} : memref<1x32x1xf32, #tpu.memory_space<vmem>>, vector<1x32x1xf32>,
      %c0_25 = arith.constant 0 : index
      %c0_26 = arith.constant 0 : index
      %28 = vector.load %arg8[%c0_25, %c0_26] : memref<32x1xf32, #tpu.memory_space<vmem>>, vector<32x1xf32>
      %c0_27 = arith.constant 0 : index
      %c0_28 = arith.constant 0 : index
      %c0_29 = arith.constant 0 : index
      %29 = vector.load %arg6[%c0_27, %c0_28, %c0_29] : memref<1x32x1xf32, #tpu.memory_space<vmem>>, vector<1x32x1xf32>
      %30 = vector.shape_cast %29 : vector<1x32x1xf32> to vector<32x1xf32>
      %31 = vector.shape_cast %28 : vector<32x1xf32> to vector<1x32x1xf32>
      tpu.vector_store %arg6[%c0_27, %c0_28, %c0_29], %31 {strides = array<i32>} : memref<1x32x1xf32, #tpu.memory_space<vmem>>, vector<1x32x1xf32>,
    } else {
    }
    return
  }
  func.func @transform_0(%arg0: i32, %arg1: i32) -> (i32, i32, i32) {
    %c0_i32 = arith.constant 0 : i32
    %c0_i32_0 = arith.constant 0 : i32
    return %arg0, %c0_i32, %arg1 : i32, i32, i32
  }
  func.func @transform_1(%arg0: i32, %arg1: i32) -> (i32, i32) {
    %c0_i32 = arith.constant 0 : i32
    %c0_i32_0 = arith.constant 0 : i32
    %c0_i32_1 = arith.constant 0 : i32
    return %c0_i32, %c0_i32_0 : i32, i32
  }
  func.func @transform_2(%arg0: i32, %arg1: i32) -> (i32, i32, i32) {
    %c0_i32 = arith.constant 0 : i32
    %c0_i32_0 = arith.constant 0 : i32
    return %arg0, %c0_i32, %arg1 : i32, i32, i32
  }
  func.func @transform_3(%arg0: i32, %arg1: i32) -> (i32, i32, i32) {
    %c0_i32 = arith.constant 0 : i32
    %c0_i32_0 = arith.constant 0 : i32
    %c0_i32_1 = arith.constant 0 : i32
    return %arg0, %c0_i32, %c0_i32_0 : i32, i32, i32
  }
  func.func @transform_4(%arg0: i32, %arg1: i32) -> (i32, i32, i32) {
    %c0_i32 = arith.constant 0 : i32
    %c0_i32_0 = arith.constant 0 : i32
    %c0_i32_1 = arith.constant 0 : i32
    return %arg0, %c0_i32, %c0_i32_0 : i32, i32, i32
  }
}

</mosaic_0001>

<bundles_post_ra>
// kernel: tpu_custom_call.1
= control target key start
LH: loop header
LB: loop body
LE: loop exit
PB: predicated region body
PF: predicated region fallthrough
CT: control target
= control target key end

     0   :  { %10 = vsyncpa [#allocation5], 0  ;;  %s1204_s0 = inlined_call_operand.vmem [shape: f32[2,108,512], index: 0, kind: input, shape index: {}]   ;;  %s1205_s1 = inlined_call_operand.vmem [shape: f32[32,108], index: 1, kind: input, shape index: {}]   ;;  %s1206_s2 = inlined_call_operand.hbm [shape: f32[2,32,512], index: 2, kind: output, shape index: {0}]   ;;  %s1207_s3 = inlined_call_operand.vmem [shape: f32[2,32,1], index: 3, kind: output, shape index: {1}]   ;;  %s1208_s4 = inlined_call_operand.vmem [shape: f32[2,32,1], index: 4, kind: output, shape index: {2}]  }
   0x1   :  { %12 = vsyncpa [#allocation5 + $0x1], 0  ;;  %s952_s15 = smov 0   ;;  %s954_s16 = smov 0  }
   0x2   :  { %s956_s17 = smov 0   ;;  %s958_s18 = smov 0  }
   0x3   :  { %s960_s19 = smov 0   ;;  %s962_s20 = smov 0  }
   0x4 LB: > { %s746_s21 = sadd.s32 4294967295, %s922_s20   ;;  %s747_s22 = sadd.s32 4294967294, %s922_s20   ;;  %s922_s20 = sphi %s962_s20, %s18_s20   ;;  %s918_s19 = sphi %s960_s19, %s1215_s19   ;;  %s914_s18 = sphi %s958_s18, %s1214_s18   ;;  %s910_s17 = sphi %s956_s17, %s1213_s17   ;;  %s906_s16 = sphi %s954_s16, %s1212_s16   ;;  %s902_s15 = sphi %s952_s15, %s1211_s15  }
   0x5   : > { %s30_s23 = sadd.s32 1, %s918_s19  ;;  %s88_s24 = sadd.s32 1, %s910_s17 }
   0x6   : > { %p32_p0 = scmp.ge.s32.totalorder %s30_s23, 2  ;;  %p98_p1 = scmp.ne.s32.totalorder %s910_s17, %s906_s16 }
   0x7   : > { %p99_p2 = scmp.eq.s32.totalorder %s746_s21, 1  ;;  %p104_p3 = scmp.ne.s32.totalorder %s906_s16, %s902_s15 }
   0x8   : > { %s1217_s23 = smov (%p32_p0, %s30_s23), 0  ;;  %p105_p5 = scmp.eq.s32.totalorder %s747_s22, 1 }
   0x9   : > { %p992_p4 = por %p99_p2, %p98_p1  ;;  %s83_s26 = ssub.s32 %s918_s19, %s1217_s23 }
   0xa   : > { %p750_p6 = scmp.ge.s32.totalorder %s922_s20, 1  ;;  %p86_p7 = scmp.eq.s32.totalorder %s83_s26, 0 }
   0xb   : > { %p999_p8 = por %p105_p5, %p104_p3  ;;  %p191_p9 = scmp.lt.s32.totalorder %s922_s20, 3 }
   0xc   : > { %s1005_s28 = scalar_select %p86_p7, %s910_s17, %s88_s24  }
   0xd   : > { %p192_p10 = pnand %p750_p6, %p191_p9 }
   0xe   : > { %p232_p11 = scmp.lt.s32.totalorder (!%p192_p10), %s914_s18, 1  ;;  %s214_s22 = sand.u32 (!%p192_p10), 1, %s906_s16  }
   0xf   : > { %195 = sbr.rel (%p192_p10) target bundleno = 348 (0x15c), region = 28  ;;  %s751_s24 = sshll.u32 (!%p192_p10), %s214_s22, 7 }
  0x10   : > { %s1104_s26 = scalar_lea.vmem (!%p192_p10), [#allocation4], %s751_s24  ;;  %s584_s10 = scalar_lea.sflag (!%p192_p10), [#allocation5], %s214_s22 }
  0x11   : > { %s608_s8 = sshll.u32 (!%p192_p10), %s1104_s26, 4  ;;  %s864_s14 = scalar_lea.hbm (!%p192_p10), %s1206_s2, 256  ;;  %s609_s8 = int_to_ptr.vmem [resolvable:$true] %s608_s8 }
  0x14   : > { %s1009_s29 = scalar_select %p232_p11, %s914_s18, 1  ;;  %vm325_vm0 = vcmask 1043456   ;;  %v252_v54 = vld [vmem:[%s1205_s1] sm:$0xff]  ;;  %vm312_vm1 = vcmask 883712   ;;  %v253_v57 = vld [vmem:[%s1205_s1 + $0x8] sm:$0xff]  ;;  %v254_v58 = vld [vmem:[%s1205_s1 + $0x10] sm:$0xff] }
  0x15   : > { %v255_v59 = vld [vmem:[%s1205_s1 + $0x18] sm:$0xff]  ;;  %vm530_vm2 = vcmask 7168  }
  0x16   : > { %s785_s30 = smul.u32 448, %s1009_s29 }
  0x18   : > { %s1015_s7 = scalar_lea.vmem %s1204_s0, %s785_s30  ;;  %s784_s30 = sshll.u32 %s914_s18, 7 }
  0x19   : > { %v310_v0 = vld [vmem:[%s1015_s7 + $0x1b0] sm:$0xf]  ;;  %v311_v2 = vld [vmem:[%s1015_s7 + $0x1b8] sm:$0xf]  ;;  %v308_v3 = vld [vmem:[%s1015_s7 + $0x1a0] sm:$0xf] }
  0x1a   : > { %v306_v1 = vld [vmem:[%s1015_s7 + $0x190] sm:$0xff]  ;;  %767 = vmatpush.msk.msra.mxu2 %vm325_vm0, %v310_v0  ;;  %772 = vmatpush.msk.msra.mxu3 %vm325_vm0, %v311_v2  ;;  %v309_v4 = vld [vmem:[%s1015_s7 + $0x1a8] sm:$0xf]  ;;  %v307_v6 = vld [vmem:[%s1015_s7 + $0x198] sm:$0xff] }
  0x1b   : > { %v302_v5 = vld [vmem:[%s1015_s7 + $0x170] sm:$0xff]  ;;  %757 = vmatpush.msk.msra.mxu0 %vm325_vm0, %v308_v3  ;;  %762 = vmatpush.msk.msra.mxu1 %vm325_vm0, %v309_v4  ;;  %v304_v7 = vld [vmem:[%s1015_s7 + $0x180] sm:$0xff]  ;;  %v305_v8 = vld [vmem:[%s1015_s7 + $0x188] sm:$0xff] }
  0x1c   : > { %399 = vmatpush.msra.mxu2 %v306_v1  ;;  %428 = vmatpush.msra.mxu3 %v307_v6  ;;  %v303_v9 = vld [vmem:[%s1015_s7 + $0x178] sm:$0xff]  ;;  %v300_v10 = vld [vmem:[%s1015_s7 + $0x160] sm:$0xff]  ;;  %v298_v11 = vld [vmem:[%s1015_s7 + $0x150] sm:$0xff] }
  0x1d   : > { %341 = vmatpush.msra.mxu0 %v304_v7  ;;  %370 = vmatpush.msra.mxu1 %v305_v8  ;;  %v301_v12 = vld [vmem:[%s1015_s7 + $0x168] sm:$0xff]  ;;  %v299_v13 = vld [vmem:[%s1015_s7 + $0x158] sm:$0xff]  ;;  %v296_v14 = vld [vmem:[%s1015_s7 + $0x140] sm:$0xff] }
  0x1e   : > { %400 = vmatpush.msra.mxu2 %v302_v5  ;;  %429 = vmatpush.msra.mxu3 %v303_v9  ;;  %v297_v15 = vld [vmem:[%s1015_s7 + $0x148] sm:$0xff]  ;;  %v294_v16 = vld [vmem:[%s1015_s7 + $0x130] sm:$0xff]  ;;  %v295_v17 = vld [vmem:[%s1015_s7 + $0x138] sm:$0xff] }
  0x1f   : > { %342 = vmatpush.msra.mxu0 %v300_v10  ;;  %371 = vmatpush.msra.mxu1 %v301_v12  ;;  %v292_v18 = vld [vmem:[%s1015_s7 + $0x120] sm:$0xff]  ;;  %v293_v19 = vld [vmem:[%s1015_s7 + $0x128] sm:$0xff]  ;;  %v290_v20 = vld [vmem:[%s1015_s7 + $0x110] sm:$0xff] }
  0x20   : > { %401 = vmatpush.msra.mxu2 %v298_v11  ;;  %430 = vmatpush.msra.mxu3 %v299_v13  ;;  %v291_v21 = vld [vmem:[%s1015_s7 + $0x118] sm:$0xff]  ;;  %v288_v22 = vld [vmem:[%s1015_s7 + $0x100] sm:$0xff]  ;;  %v289_v23 = vld [vmem:[%s1015_s7 + $0x108] sm:$0xff] }
  0x21   : > { %343 = vmatpush.msra.mxu0 %v296_v14  ;;  %372 = vmatpush.msra.mxu1 %v297_v15  ;;  %v286_v24 = vld [vmem:[%s1015_s7 + $0xf0] sm:$0xff]  ;;  %v287_v25 = vld [vmem:[%s1015_s7 + $0xf8] sm:$0xff]  ;;  %v284_v26 = vld [vmem:[%s1015_s7 + $0xe0] sm:$0xff] }
  0x22   : > { %402 = vmatpush.msra.mxu2 %v294_v16  ;;  %431 = vmatpush.msra.mxu3 %v295_v17  ;;  %v285_v27 = vld [vmem:[%s1015_s7 + $0xe8] sm:$0xff]  ;;  %v282_v28 = vld [vmem:[%s1015_s7 + $0xd0] sm:$0xff]  ;;  %v283_v29 = vld [vmem:[%s1015_s7 + $0xd8] sm:$0xff]  ;;  %v924_v16 = vmov 0.0  }
  0x23   : > { %344 = vmatpush.msra.mxu0 %v292_v18  ;;  %373 = vmatpush.msra.mxu1 %v293_v19  ;;  %v280_v30 = vld [vmem:[%s1015_s7 + $0xc0] sm:$0xff]  ;;  %v281_v31 = vld [vmem:[%s1015_s7 + $0xc8] sm:$0xff]  ;;  %v278_v32 = vld [vmem:[%s1015_s7 + $0xb0] sm:$0xff]  ;;  %531 = vst.msk [vmem:[#allocation2] sm:$0xff] %vm530_vm2, %v924_v16 }
  0x24   : > { %403 = vmatpush.msra.mxu2 %v290_v20  ;;  %432 = vmatpush.msra.mxu3 %v291_v21  ;;  %v279_v33 = vld [vmem:[%s1015_s7 + $0xb8] sm:$0xff]  ;;  %v276_v34 = vld [vmem:[%s1015_s7 + $0xa0] sm:$0xff]  ;;  %v277_v35 = vld [vmem:[%s1015_s7 + $0xa8] sm:$0xff]  ;;  %532 = vst.msk [vmem:[#allocation2 + $0x8] sm:$0xff] %vm530_vm2, %v924_v16 }
  0x25   : > { %345 = vmatpush.msra.mxu0 %v288_v22  ;;  %374 = vmatpush.msra.mxu1 %v289_v23  ;;  %v274_v36 = vld [vmem:[%s1015_s7 + $0x90] sm:$0xff]  ;;  %v275_v37 = vld [vmem:[%s1015_s7 + $0x98] sm:$0xff]  ;;  %v272_v38 = vld [vmem:[%s1015_s7 + $0x80] sm:$0xff]  ;;  %533 = vst.msk [vmem:[#allocation2 + $0x10] sm:$0xff] %vm530_vm2, %v924_v16 }
  0x26   : > { %404 = vmatpush.msra.mxu2 %v286_v24  ;;  %433 = vmatpush.msra.mxu3 %v287_v25  ;;  %v273_v39 = vld [vmem:[%s1015_s7 + $0x88] sm:$0xff]  ;;  %v270_v40 = vld [vmem:[%s1015_s7 + $0x70] sm:$0xff]  ;;  %v271_v41 = vld [vmem:[%s1015_s7 + $0x78] sm:$0xff]  ;;  %534 = vst.msk [vmem:[#allocation2 + $0x18] sm:$0xff] %vm530_vm2, %v924_v16 }
  0x27   : > { %346 = vmatpush.msra.mxu0 %v284_v26  ;;  %375 = vmatpush.msra.mxu1 %v285_v27  ;;  %v268_v42 = vld [vmem:[%s1015_s7 + $0x60] sm:$0xff]  ;;  %v269_v43 = vld [vmem:[%s1015_s7 + $0x68] sm:$0xff]  ;;  %v266_v44 = vld [vmem:[%s1015_s7 + $0x50] sm:$0xff]  ;;  %535 = vst.msk [vmem:[#allocation3] sm:$0xff] %vm530_vm2, %v924_v16 }
  0x28   : > { %405 = vmatpush.msra.mxu2 %v282_v28  ;;  %434 = vmatpush.msra.mxu3 %v283_v29  ;;  %v267_v45 = vld [vmem:[%s1015_s7 + $0x58] sm:$0xff]  ;;  %v264_v46 = vld [vmem:[%s1015_s7 + $0x40] sm:$0xff]  ;;  %v265_v47 = vld [vmem:[%s1015_s7 + $0x48] sm:$0xff]  ;;  %536 = vst.msk [vmem:[#allocation3 + $0x8] sm:$0xff] %vm530_vm2, %v924_v16 }
  0x29   : > { %347 = vmatpush.msra.mxu0 %v280_v30  ;;  %376 = vmatpush.msra.mxu1 %v281_v31  ;;  %v262_v48 = vld [vmem:[%s1015_s7 + $0x30] sm:$0xff]  ;;  %v263_v49 = vld [vmem:[%s1015_s7 + $0x38] sm:$0xff]  ;;  %v260_v50 = vld [vmem:[%s1015_s7 + $0x20] sm:$0xff]  ;;  %537 = vst.msk [vmem:[#allocation3 + $0x10] sm:$0xff] %vm530_vm2, %v924_v16 }
  0x2a   : > { %406 = vmatpush.msra.mxu2 %v278_v32  ;;  %435 = vmatpush.msra.mxu3 %v279_v33  ;;  %v261_v51 = vld [vmem:[%s1015_s7 + $0x28] sm:$0xff]  ;;  %v258_v52 = vld [vmem:[%s1015_s7 + $0x10] sm:$0xff]  ;;  %v259_v53 = vld [vmem:[%s1015_s7 + $0x18] sm:$0xff]  ;;  %538 = vst.msk [vmem:[#allocation3 + $0x18] sm:$0xff] %vm530_vm2, %v924_v16 }
  0x2b   : > { %348 = vmatpush.msra.mxu0 %v276_v34  ;;  %377 = vmatpush.msra.mxu1 %v277_v35  ;;  %v256_v55 = vld [vmem:[%s1015_s7] sm:$0xff]  ;;  %v257_v56 = vld [vmem:[%s1015_s7 + $0x8] sm:$0xff]  ;;  %s607_s7 = scalar_lea.hbm %s1206_s2, %s784_s30 }
  0x2c   : > { %407 = vmatpush.msra.mxu2 %v274_v36  ;;  %436 = vmatpush.msra.mxu3 %v275_v37  ;;  %s610_s9 = sshll.u32 %s607_s7, 4  ;;  %s611_s9 = int_to_ptr.hbm [resolvable:$true] %s610_s9 }
  0x2d   : > { %349 = vmatpush.msra.mxu0 %v272_v38  ;;  %378 = vmatpush.msra.mxu1 %v273_v39  ;;  %s858_s11 = sshra.s32 %s611_s9, 4  ;;  %s859_s11 = int_to_ptr.hbm [resolvable:$true] %s858_s11 }
  0x2e   : > { %408 = vmatpush.msra.mxu2 %v270_v40  ;;  %437 = vmatpush.msra.mxu3 %v271_v41  ;;  %s860_s12 = scalar_lea.hbm %s859_s11, 128  ;;  %p865_p1 = scmp.lt.s32.totalorder %s859_s11, %s1206_s2 }
  0x2f   : > { %350 = vmatpush.msra.mxu0 %v268_v42  ;;  %379 = vmatpush.msra.mxu1 %v269_v43  ;;  %p861_p12 = scmp.ne.s32.totalorder %s859_s11, %s860_s12  ;;  %p866_p2 = scmp.lt.s32.totalorder %s864_s14, %s860_s12 }
  0x30   : > { %409 = vmatpush.msra.mxu2 %v266_v44  ;;  %438 = vmatpush.msra.mxu3 %v267_v45 }
  0x31   : > { %351 = vmatpush.msra.mxu0 %v264_v46  ;;  %380 = vmatpush.msra.mxu1 %v265_v47  ;;  %p862_p13 = pnand %p861_p12, %p992_p4  ;;  %p867_p3 = por %p866_p2, %p865_p1 }
  0x32   : > { %410 = vmatpush.msra.mxu2 %v262_v48  ;;  %439 = vmatpush.msra.mxu3 %v263_v49 }
  0x33   : > { %352 = vmatpush.msra.mxu0 %v260_v50  ;;  %381 = vmatpush.msra.mxu1 %v261_v51  ;;  %p863_p0 = pneg %p862_p13 }
  0x34   : > { %411 = vmatpush.msra.mxu2 %v258_v52  ;;  %440 = vmatpush.msra.mxu3 %v259_v53 }
  0x35   : > { %768 = vmatmul.msk.f32.vlgmr.msra.gmra.mxu2 %vm312_vm1, %v252_v54  ;;  %773 = vmatmul.msk.f32.vlgmr.msra.gmra.mxu3 %vm312_vm1, %v252_v54  ;;  %p868_p5 = pnand %p867_p3, %p863_p0 }
  0x36   : > { %353 = vmatpush.msra.mxu0 %v256_v55  ;;  %382 = vmatpush.msra.mxu1 %v257_v56 }
  0x37   : > { %758 = vmatmul.msk.f32.vlgmr.msra.gmra.mxu0 %vm312_vm1, %v252_v54  ;;  %763 = vmatmul.msk.f32.vlgmr.msra.gmra.mxu1 %vm312_vm1, %v252_v54 }
  0x3d   : > { %769 = vmatmul.msk.f32.gmra.mxu2 %vm312_vm1, %v253_v57  ;;  %774 = vmatmul.msk.f32.gmra.mxu3 %vm312_vm1, %v253_v57 }
  0x3f   : > { %759 = vmatmul.msk.f32.gmra.mxu0 %vm312_vm1, %v253_v57  ;;  %764 = vmatmul.msk.f32.gmra.mxu1 %vm312_vm1, %v253_v57 }
  0x45   : > { %770 = vmatmul.msk.f32.gmra.mxu2 %vm312_vm1, %v254_v58  ;;  %775 = vmatmul.msk.f32.gmra.mxu3 %vm312_vm1, %v254_v58 }
  0x47   : > { %760 = vmatmul.msk.f32.gmra.mxu0 %vm312_vm1, %v254_v58  ;;  %765 = vmatmul.msk.f32.gmra.mxu1 %vm312_vm1, %v254_v58 }
  0x4d   : > { %771 = vmatmul.msk.f32.gmra.mxu2 %vm312_vm1, %v255_v59  ;;  %776 = vmatmul.msk.f32.gmra.mxu3 %vm312_vm1, %v255_v59 }
  0x4f   : > { %761 = vmatmul.msk.f32.gmra.mxu0 %vm312_vm1, %v255_v59  ;;  %766 = vmatmul.msk.f32.gmra.mxu1 %vm312_vm1, %v255_v59 }
  0xb4   : > { %v355_v60 = vpop.f32.mrf.mxu0  ;;  %v384_v61 = vpop.f32.mrf.mxu1 }
  0xb5   : > { %454 = vst [vmem:[%s1104_s26] sm:$0xff] %v355_v60  ;;  %v490_v62 = vmul.f32 %v355_v60, %v355_v60  ;;  %v470_v63 = vadd.f32 %v384_v61, %v355_v60  ;;  %v491_v0 = vmul.f32 %v384_v61, %v384_v61 }
  0xb6   : > { %455 = vst [vmem:[%s1104_s26 + $0x8] sm:$0xff] %v384_v61 }
  0xb7   : > { %v506_v1 = vadd.f32 %v491_v0, %v490_v62 }
  0xb8   : > { %v413_v2 = vpop.f32.mrf.mxu2  ;;  %v442_v3 = vpop.f32.mrf.mxu3 }
  0xb9   : > { %456 = vst [vmem:[%s1104_s26 + $0x10] sm:$0xff] %v413_v2  ;;  %v492_v4 = vmul.f32 %v413_v2, %v413_v2  ;;  %v471_v5 = vadd.f32 %v470_v63, %v413_v2  ;;  %v493_v6 = vmul.f32 %v442_v3, %v442_v3 }
  0xba   : > { %457 = vst [vmem:[%s1104_s26 + $0x18] sm:$0xff] %v442_v3 }
  0xbb   : > { %v472_v7 = vadd.f32 %v471_v5, %v442_v3  ;;  %v507_v8 = vadd.f32 %v506_v1, %v492_v4 }
  0xbc   : > { %v358_v9 = vpop.f32.mrf.mxu0  ;;  %v387_v10 = vpop.f32.mrf.mxu1 }
  0xbd   : > { %473 = vadd.xlane.f32.xlu0 %v472_v7  ;;  %458 = vst [vmem:[%s1104_s26 + $0x20] sm:$0xff] %v358_v9  ;;  %v494_v11 = vmul.f32 %v358_v9, %v358_v9  ;;  %v475_v12 = vadd.f32 %v387_v10, %v358_v9  ;;  %v495_v13 = vmul.f32 %v387_v10, %v387_v10 }
  0xbe   : > { %459 = vst [vmem:[%s1104_s26 + $0x28] sm:$0xff] %v387_v10  ;;  %v508_v14 = vadd.f32 %v507_v8, %v493_v6 }
  0xbf   : > { %v511_v15 = vadd.f32 %v495_v13, %v494_v11 }
  0xc0   : > { %509 = vadd.xlane.f32.xlu2 %v508_v14  ;;  %v416_v17 = vpop.f32.mrf.mxu2  ;;  %v445_v18 = vpop.f32.mrf.mxu3 }
  0xc1   : > { %460 = vst [vmem:[%s1104_s26 + $0x30] sm:$0xff] %v416_v17  ;;  %v496_v19 = vmul.f32 %v416_v17, %v416_v17  ;;  %v476_v20 = vadd.f32 %v475_v12, %v416_v17  ;;  %v497_v21 = vmul.f32 %v445_v18, %v445_v18 }
  0xc2   : > { %461 = vst [vmem:[%s1104_s26 + $0x38] sm:$0xff] %v445_v18 }
  0xc3   : > { %v477_v22 = vadd.f32 %v476_v20, %v445_v18  ;;  %v512_v23 = vadd.f32 %v511_v15, %v496_v19 }
  0xc4   : > { %v361_v24 = vpop.f32.mrf.mxu0  ;;  %v390_v25 = vpop.f32.mrf.mxu1 }
  0xc5   : > { %478 = vadd.xlane.f32.xlu0 %v477_v22  ;;  %462 = vst [vmem:[%s1104_s26 + $0x40] sm:$0xff] %v361_v24  ;;  %v498_v26 = vmul.f32 %v361_v24, %v361_v24  ;;  %v480_v27 = vadd.f32 %v390_v25, %v361_v24  ;;  %v499_v28 = vmul.f32 %v390_v25, %v390_v25 }
  0xc6   : > { %463 = vst [vmem:[%s1104_s26 + $0x48] sm:$0xff] %v390_v25  ;;  %v513_v29 = vadd.f32 %v512_v23, %v497_v21 }
  0xc7   : > { %v516_v30 = vadd.f32 %v499_v28, %v498_v26 }
  0xc8   : > { %514 = vadd.xlane.f32.xlu2 %v513_v29  ;;  %v419_v31 = vpop.f32.mrf.mxu2  ;;  %v448_v32 = vpop.f32.mrf.mxu3 }
  0xc9   : > { %464 = vst [vmem:[%s1104_s26 + $0x50] sm:$0xff] %v419_v31  ;;  %v500_v33 = vmul.f32 %v419_v31, %v419_v31  ;;  %v481_v34 = vadd.f32 %v480_v27, %v419_v31  ;;  %v501_v35 = vmul.f32 %v448_v32, %v448_v32 }
  0xca   : > { %465 = vst [vmem:[%s1104_s26 + $0x58] sm:$0xff] %v448_v32 }
  0xcb   : > { %v482_v36 = vadd.f32 %v481_v34, %v448_v32  ;;  %v517_v37 = vadd.f32 %v516_v30, %v500_v33 }
  0xcc   : > { %v364_v38 = vpop.f32.mrf.mxu0  ;;  %v393_v39 = vpop.f32.mrf.mxu1 }
  0xcd   : > { %483 = vadd.xlane.f32.xlu1 %v482_v36  ;;  %466 = vst [vmem:[%s1104_s26 + $0x60] sm:$0xff] %v364_v38  ;;  %v485_v40 = vadd.f32 %v393_v39, %v364_v38  ;;  %v518_v41 = vadd.f32 %v517_v37, %v501_v35  ;;  %v502_v42 = vmul.f32 %v364_v38, %v364_v38 }
  0xce   : > { %467 = vst [vmem:[%s1104_s26 + $0x68] sm:$0xff] %v393_v39  ;;  %v503_v43 = vmul.f32 %v393_v39, %v393_v39 }
  0xcf   : > { %519 = vadd.xlane.f32.xlu0 %v518_v41 }
  0xd0   : > { %v422_v44 = vpop.f32.mrf.mxu2  ;;  %v451_v45 = vpop.f32.mrf.mxu3  ;;  %v521_v47 = vadd.f32 %v503_v43, %v502_v42 }
  0xd1   : > { %468 = vst [vmem:[%s1104_s26 + $0x70] sm:$0xff] %v422_v44  ;;  %v486_v46 = vadd.f32 %v485_v40, %v422_v44  ;;  %v504_v48 = vmul.f32 %v422_v44, %v422_v44  ;;  %v505_v50 = vmul.f32 %v451_v45, %v451_v45 }
  0xd2   : > { %469 = vst [vmem:[%s1104_s26 + $0x78] sm:$0xff] %v451_v45 }
  0xd3   : > { %v487_v49 = vadd.f32 %v486_v46, %v451_v45  ;;  %v522_v51 = vadd.f32 %v521_v47, %v504_v48 }
  0xd5   : > { %488 = vadd.xlane.f32.xlu1 %v487_v49  ;;  %v523_v52 = vadd.f32 %v522_v51, %v505_v50 }
  0xdd   : > { %524 = vadd.xlane.f32.xlu1 %v523_v52 }
  0xde   : > { %871 = shalt.err (!%p868_p5)
}
  0xdf   : > { %s925_s22 = smov 512   ;;  %s926_s26 = smov 32   ;;  %v539_v53 = vld [vmem:[#allocation2] sm:$0xff]  ;;  %v540_v59 = vld [vmem:[#allocation2 + $0x8] sm:$0xff]  ;;  %v541_v3 = vld [vmem:[#allocation2 + $0x10] sm:$0xff] }
  0xe0   : > { %786 = dma.vmem_to_hbm [thread:$0]  (%p992_p4), %s609_s8, 2048, %s611_s9, %s584_s10, %s925_s22, %s925_s22, %s926_s26   ;;  %v552_v56 = vld [vmem:[#allocation3] sm:$0xff]  ;;  %v553_v62 = vld [vmem:[#allocation3 + $0x8] sm:$0xff]  ;;  %v554_v6 = vld [vmem:[#allocation3 + $0x10] sm:$0xff] }
  0xe1   : > { %s782_s30 = sshll.u32 %s1009_s29, 5  ;;  %v542_v11 = vld [vmem:[#allocation2 + $0x18] sm:$0xff] }
  0xe2   : > { %s1153_s7 = scalar_lea.vmem %s1207_s3, %s782_s30  ;;  %s1160_s29 = scalar_lea.vmem %s1208_s4, %s782_s30  ;;  %v555_v16 = vld [vmem:[#allocation3 + $0x18] sm:$0xff] }
 0x130   : > { %v474_v54 = vpop.xlane.xlu0 %473 }
 0x131   : > { %v543_v55 = vadd.f32 %v539_v53, %v474_v54 }
 0x133   : > { %548 = vst.msk [vmem:[#allocation2] sm:$0xff] %vm530_vm2, %v543_v55  ;;  %v510_v57 = vpop.xlane.xlu2 %509 }
 0x134   : > { %v556_v58 = vadd.f32 %v552_v56, %v510_v57 }
 0x136   : > { %560 = vst.msk [vmem:[#allocation3] sm:$0xff] %vm530_vm2, %v556_v58 }
 0x138   : > { %v479_v60 = vpop.xlane.xlu0 %478 }
 0x139   : > { %v544_v61 = vadd.f32 %v540_v59, %v479_v60 }
 0x13a   : > { %v567_v63 = vld [vmem:[#allocation2] sm:$0xff] }
 0x13b   : > { %571 = vst.msk [vmem:[%s1153_s7] sm:$0xff] %vm530_vm2, %v567_v63  ;;  %v515_v0 = vpop.xlane.xlu2 %514 }
 0x13c   : > { %549 = vst.msk [vmem:[#allocation2 + $0x8] sm:$0xff] %vm530_vm2, %v544_v61  ;;  %v557_v1 = vadd.f32 %v553_v62, %v515_v0 }
 0x13d   : > { %v575_v2 = vld [vmem:[#allocation3] sm:$0xff] }
 0x13e   : > { %579 = vst.msk [vmem:[%s1160_s29] sm:$0xff] %vm530_vm2, %v575_v2 }
 0x13f   : > { %561 = vst.msk [vmem:[#allocation3 + $0x8] sm:$0xff] %vm530_vm2, %v557_v1 }
 0x140   : > { %v484_v4 = vpop.xlane.xlu1 %483 }
 0x141   : > { %v545_v5 = vadd.f32 %v541_v3, %v484_v4 }
 0x142   : > { %v520_v8 = vpop.xlane.xlu0 %519 }
 0x143   : > { %v568_v7 = vld [vmem:[#allocation2 + $0x8] sm:$0xff]  ;;  %550 = vst.msk [vmem:[#allocation2 + $0x10] sm:$0xff] %vm530_vm2, %v545_v5  ;;  %v558_v9 = vadd.f32 %v554_v6, %v520_v8 }
 0x144   : > { %572 = vst.msk [vmem:[%s1153_s7 + $0x8] sm:$0xff] %vm530_vm2, %v568_v7 }
 0x145   : > { %562 = vst.msk [vmem:[#allocation3 + $0x10] sm:$0xff] %vm530_vm2, %v558_v9 }
 0x146   : > { %v576_v10 = vld [vmem:[#allocation3 + $0x8] sm:$0xff] }
 0x147   : > { %580 = vst.msk [vmem:[%s1160_s29 + $0x8] sm:$0xff] %vm530_vm2, %v576_v10 }
 0x148   : > { %v489_v12 = vpop.xlane.xlu1 %488 }
 0x149   : > { %v546_v13 = vadd.f32 %v542_v11, %v489_v12 }
 0x14a   : > { %v569_v14 = vld [vmem:[#allocation2 + $0x10] sm:$0xff] }
 0x14b   : > { %573 = vst.msk [vmem:[%s1153_s7 + $0x10] sm:$0xff] %vm530_vm2, %v569_v14 }
 0x14c   : > { %551 = vst.msk [vmem:[#allocation2 + $0x18] sm:$0xff] %vm530_vm2, %v546_v13  ;;  %v577_v15 = vld [vmem:[#allocation3 + $0x10] sm:$0xff] }
 0x14d   : > { %581 = vst.msk [vmem:[%s1160_s29 + $0x10] sm:$0xff] %vm530_vm2, %v577_v15 }
 0x150   : > { %v525_v17 = vpop.xlane.xlu1 %524 }
 0x151   : > { %v559_v18 = vadd.f32 %v555_v16, %v525_v17 }
 0x153   : > { %v570_v19 = vld [vmem:[#allocation2 + $0x18] sm:$0xff]  ;;  %563 = vst.msk [vmem:[#allocation3 + $0x18] sm:$0xff] %vm530_vm2, %v559_v18 }
 0x154   : > { %574 = vst.msk [vmem:[%s1153_s7 + $0x18] sm:$0xff] %vm530_vm2, %v570_v19 }
 0x15a   : > { %v578_v20 = vld [vmem:[#allocation3 + $0x18] sm:$0xff] }
 0x15b   : > { %582 = vst.msk [vmem:[%s1160_s29 + $0x18] sm:$0xff] %vm530_vm2, %v578_v20 }
 0x15c PF: > { %p792_p4 = scmp.ge.s32.totalorder %s922_s20, 2  ;;  %s631_s9 = sand.u32 1, %s902_s15  }
 0x15d   : > { %s632_s10 = scalar_lea.sflag [#allocation5], %s631_s9 }
 0x15e   : > { %p789_p6 = pnand %p792_p4, %p999_p8 }
 0x160   : > { %p790_p7 = pneg %p789_p6 }
 0x162   : > { %897 = dma.done.wait (%p790_p7), %s632_s10, 2048  }
 0x163   : > { %899 = vsyncadd (%p790_p7), %s632_s10, 4294965248  ;;  %s18_s20 = sadd.s32 1, %s922_s20   ;;  %s1211_s15 = smov %s906_s16 }
 0x164   : > { %p15_p9 = scmp.ge.s32.totalorder %s18_s20, 4   ;;  %s1212_s16 = smov %s910_s17 }
 0x165   : > { %s1213_s17 = smov %s1005_s28  ;;  %s1214_s18 = smov %s918_s19 }
 0x166   : > { %s1215_s19 = smov %s1217_s23  ;;  %17 = sbr.rel (!%p15_p9) target bundleno = 4 (0x4), region = 95 }
 0x16b   :  { %654 = vsyncpa [#allocation5], 1 }
 0x16c   :  { %656 = vsyncpa [#allocation5 + $0x1], 1 }

</bundles_post_ra>
